<compile_context>
chip_gen: v7x
topology: tpu7x:2x2x1
jax: 0.10.0
libtpu: 0.0.40
codegen_flags: <defaults>
</compile_context>

<pallas_src>
import functools
import math

import jax
import jax.numpy as jnp
from jax.experimental import pallas as pl
from jax.experimental.pallas import tpu as pltpu


# ----------------------------------------------------------------------------
# Kernel: whole forward pass (sinusoidal embedding + MLP) in one invocation.
# ----------------------------------------------------------------------------
def timestep_embedder_kernel(t_ref, w1_ref, w2_ref, b_ref, out_ref,
                             *, half, max_period):
    two_half = 2 * half

    # ---- sinusoidal timestep embedding, built fully in-kernel ---------------
    # lane index 0..2*half-1; lanes [0, half) are the cos features, lanes
    # [half, 2*half) are the sin features (sin(x) == cos(x - pi/2)), so the
    # whole embedding is one lane-dense (B, 2*half) tile and a single cos().
    lane = jax.lax.broadcasted_iota(jnp.int32, (1, two_half), 1)
    is_sin = lane >= half
    col = jnp.where(is_sin, lane - half, lane).astype(jnp.float32)
    # f_i = exp(-log(max_period) * i / half), duplicated across both halves.
    freqs = jnp.exp(col * jnp.float32(-math.log(max_period) / half))
    phase = jnp.where(is_sin, jnp.float32(math.pi / 2), jnp.float32(0.0))

    # (B, 1) * (1, 2*half) -> (B, 2*half); all in f32 (t can be up to ~1e2 and
    # bf16 phase error in the sinusoid would be unacceptable).
    args = t_ref[...] * freqs - phase
    emb = jnp.cos(args)                               # [cos | sin], f32

    # ---- MLP: Linear(2*half -> H) -> SiLU -> Linear(H -> H) -----------------
    # One K=2*half dot against the full w1; only the MXU operands go to bf16,
    # accumulation stays f32 (preferred_element_type).
    h = (jnp.dot(emb.astype(jnp.bfloat16), w1_ref[...],
                 preferred_element_type=jnp.float32)
         + b_ref[0:1, :])
    # SiLU in f32; logistic lowers to the otherwise-idle EUP slot.
    h = h * jax.nn.sigmoid(h)
    out_ref[...] = (jnp.dot(h.astype(jnp.bfloat16), w2_ref[...],
                            preferred_element_type=jnp.float32)
                    + b_ref[1:2, :]).astype(out_ref.dtype)


# ----------------------------------------------------------------------------
# Wrapper
# ----------------------------------------------------------------------------
def timestep_embedder(t, params, frequency_embedding_size=256, max_period=10000):
    """Pallas forward of TimestepEmbedder.

    t: (B,) timesteps (may be fractional).
    params:
      w1: (frequency_embedding_size, H) bf16
      w2: (H, H)                        bf16
      b : (2, H)                        f32   (row 0 = bias1, row 1 = bias2)
    """
    B = t.shape[0]
    hidden = params["w2"].shape[1]
    half = frequency_embedding_size // 2
    # frequency_embedding_size is even (256 by default), so the odd-dim
    # zero-pad branch of the PyTorch reference is never taken.
    assert frequency_embedding_size % 2 == 0

    t2 = t.astype(jnp.float32).reshape(B, 1)

    kernel = functools.partial(timestep_embedder_kernel,
                               half=half, max_period=max_period)
    vmem = pl.BlockSpec(memory_space=pltpu.MemorySpace.VMEM)  # whole array in VMEM
    return pl.pallas_call(
        kernel,
        out_shape=jax.ShapeDtypeStruct((B, hidden), jnp.float32),
        in_specs=[vmem] * 4,
        out_specs=vmem,
    )(t2, params["w1"], params["w2"], params["b"])


# ----------------------------------------------------------------------------
# Pure-JAX reference (mirrors PyTorch TimestepEmbedder.forward semantics,
# using the same bf16-stored weight values the kernel consumes).
# ----------------------------------------------------------------------------
def timestep_embedder_ref(t, params, frequency_embedding_size=256,
                          max_period=10000):
    half = frequency_embedding_size // 2
    freqs = jnp.exp(
        -math.log(max_period) * jnp.arange(half, dtype=jnp.float32) / half)
    args = t.astype(jnp.float32)[:, None] * freqs[None]
    emb = jnp.concatenate([jnp.cos(args), jnp.sin(args)], axis=-1)
    w1 = params["w1"].astype(jnp.float32)
    w2 = params["w2"].astype(jnp.float32)
    h = emb @ w1 + params["b"][0]
    h = h * jax.nn.sigmoid(h)                      # SiLU
    return h @ w2 + params["b"][1]


# ----------------------------------------------------------------------------
# Main
# ----------------------------------------------------------------------------
if __name__ == "__main__":
    B = 2                       # batch of timesteps
    hidden_size = 128           # lane-dense hidden width
    freq_size = 256             # frequency_embedding_size (module default)

    key = jax.random.PRNGKey(0)
    kt, k1, k2, k3, k4 = jax.random.split(key, 5)

    # Fractional timesteps, deterministic.
    t = jax.random.uniform(kt, (B,), dtype=jnp.float32, minval=0.0, maxval=100.0)

    def nrm(k, shape, s=0.02):
        return (s * jax.random.normal(k, shape)).astype(jnp.float32)

    # Weights stored as (in, out) in bf16 (halves weight DMA bytes; MXU takes
    # bf16 with f32 accumulation on v5e/v6e/v7x).  Biases stay f32, packed
    # into one (2, H) array so the kernel gets a single bias input.
    params = {
        "w1": nrm(k1, (freq_size, hidden_size)).astype(jnp.bfloat16),
        "b": jnp.concatenate(
            [nrm(k2, (1, hidden_size)), nrm(k4, (1, hidden_size))], axis=0),
        "w2": nrm(k3, (hidden_size, hidden_size)).astype(jnp.bfloat16),
    }

    out = timestep_embedder(t, params, frequency_embedding_size=freq_size)
    out = jax.block_until_ready(out)

    ref = timestep_embedder_ref(t, params, frequency_embedding_size=freq_size)
    assert out.shape == (B, hidden_size)
    # Tolerance covers the bf16 rounding of the MXU operands (activations);
    # weights are identical (both sides use the bf16-stored values).
    assert jnp.allclose(out, ref, atol=2e-3, rtol=2e-3), (
        "Pallas output mismatch: max abs err = "
        f"{float(jnp.max(jnp.abs(out - ref)))}")

    print("KERNEL_OK")
</pallas_src>

<mosaic_0001>
module attributes {stable_mosaic.version = 11 : i64} {
  func.func @timestep_embedder_kernel(%arg0: memref<2x1xf32, #tpu.memory_space<vmem>>, %arg1: memref<256x128xbf16, #tpu.memory_space<vmem>>, %arg2: memref<128x128xbf16, #tpu.memory_space<vmem>>, %arg3: memref<2x128xf32, #tpu.memory_space<vmem>>, %arg4: memref<2x128xf32, #tpu.memory_space<vmem>>) attributes {dimension_semantics = [], scalar_prefetch = 0 : i64, scratch_operands = 0 : i64, tpu.core_type = #tpu.core_type<tc>} {
    %0 = tpu.iota {dimensions = array<i32: 1>} : vector<1x256xi32>
    %c128_i32 = arith.constant 128 : i32
    %1 = vector.broadcast %c128_i32 : i32 to vector<1x256xi32>
    %2 = arith.cmpi sge, %0, %1 : vector<1x256xi32>
    %c128_i32_0 = arith.constant 128 : i32
    %3 = vector.broadcast %c128_i32_0 : i32 to vector<1x256xi32>
    %4 = arith.subi %0, %3 : vector<1x256xi32>
    %5 = arith.select %2, %4, %0 : vector<1x256xi1>, vector<1x256xi32>
    %6 = arith.sitofp %5 : vector<1x256xi32> to vector<1x256xf32>
    %cst = arith.constant -0.0719557852 : f32
    %7 = vector.broadcast %cst : f32 to vector<1x256xf32>
    %8 = arith.mulf %6, %7 : vector<1x256xf32>
    %9 = math.exp %8 : vector<1x256xf32>
    %cst_1 = arith.constant 1.57079637 : f32
    %cst_2 = arith.constant 0.000000e+00 : f32
    %10 = vector.broadcast %cst_1 : f32 to vector<1x256xf32>
    %11 = vector.broadcast %cst_2 : f32 to vector<1x256xf32>
    %12 = arith.select %2, %10, %11 : vector<1x256xi1>, vector<1x256xf32>
    %c0 = arith.constant 0 : index
    %c0_3 = arith.constant 0 : index
    %13 = vector.load %arg0[%c0, %c0_3] : memref<2x1xf32, #tpu.memory_space<vmem>>, vector<2x1xf32>
    %14 = vector.broadcast %13 : vector<2x1xf32> to vector<2x256xf32>
    %15 = vector.broadcast %9 : vector<1x256xf32> to vector<2x256xf32>
    %16 = arith.mulf %14, %15 : vector<2x256xf32>
    %17 = vector.broadcast %12 : vector<1x256xf32> to vector<2x256xf32>
    %18 = arith.subf %16, %17 : vector<2x256xf32>
    %19 = math.cos %18 : vector<2x256xf32>
    %20 = arith.truncf %19 : vector<2x256xf32> to vector<2x256xbf16>
    %c0_4 = arith.constant 0 : index
    %c0_5 = arith.constant 0 : index
    %21 = vector.load %arg1[%c0_4, %c0_5] : memref<256x128xbf16, #tpu.memory_space<vmem>>, vector<256x128xbf16>
    %cst_6 = arith.constant dense<0.000000e+00> : vector<2x128xf32>
    %22 = tpu.matmul %20, %21, %cst_6 {dimension_numbers = #tpu.dot_dimension_numbers<[1], [0], [0], [1], [0, 0, 1, 1], [], []>} : vector<2x256xbf16>, vector<256x128xbf16>, vector<2x128xf32> -> vector<2x128xf32>
    %c0_7 = arith.constant 0 : index
    %c0_8 = arith.constant 0 : index
    %23 = vector.load %arg3[%c0_7, %c0_8] : memref<2x128xf32, #tpu.memory_space<vmem>>, vector<1x128xf32>
    %24 = vector.broadcast %23 : vector<1x128xf32> to vector<2x128xf32>
    %25 = arith.addf %22, %24 : vector<2x128xf32>
    %26 = arith.negf %25 : vector<2x128xf32>
    %27 = math.exp %26 : vector<2x128xf32>
    %cst_9 = arith.constant 1.000000e+00 : f32
    %28 = vector.broadcast %cst_9 : f32 to vector<2x128xf32>
    %29 = arith.addf %28, %27 : vector<2x128xf32>
    %30 = arith.divf %28, %29 : vector<2x128xf32>
    %31 = arith.mulf %25, %30 : vector<2x128xf32>
    %32 = arith.truncf %31 : vector<2x128xf32> to vector<2x128xbf16>
    %c0_10 = arith.constant 0 : index
    %c0_11 = arith.constant 0 : index
    %33 = vector.load %arg2[%c0_10, %c0_11] : memref<128x128xbf16, #tpu.memory_space<vmem>>, vector<128x128xbf16>
    %cst_12 = arith.constant dense<0.000000e+00> : vector<2x128xf32>
    %34 = tpu.matmul %32, %33, %cst_12 {dimension_numbers = #tpu.dot_dimension_numbers<[1], [0], [0], [1], [0, 0, 1, 1], [], []>} : vector<2x128xbf16>, vector<128x128xbf16>, vector<2x128xf32> -> vector<2x128xf32>
    %c1 = arith.constant 1 : index
    %c0_13 = arith.constant 0 : index
    %35 = vector.load %arg3[%c1, %c0_13] : memref<2x128xf32, #tpu.memory_space<vmem>>, vector<1x128xf32>
    %36 = vector.broadcast %35 : vector<1x128xf32> to vector<2x128xf32>
    %37 = arith.addf %34, %36 : vector<2x128xf32>
    %c0_14 = arith.constant 0 : index
    %c0_15 = arith.constant 0 : index
    %38 = vector.load %arg4[%c0_14, %c0_15] : memref<2x128xf32, #tpu.memory_space<vmem>>, vector<2x128xf32>
    tpu.vector_store %arg4[%c0_14, %c0_15], %37 {strides = array<i32>} : memref<2x128xf32, #tpu.memory_space<vmem>>, vector<2x128xf32>,
    return
  }
}

</mosaic_0001>

<bundles_post_ra>
// kernel: tpu_custom_call.1
= control target key start
LH: loop header
LB: loop body
LE: loop exit
PB: predicated region body
PF: predicated region fallthrough
CT: control target
= control target key end

     0   :  { %9 = vsyncpa [#allocation3], 0  ;;  %s979_s0 = inlined_call_operand.vmem [shape: f32[2,1], index: 0, kind: input, shape index: {}]   ;;  %s980_s1 = inlined_call_operand.hbm [shape: bf16[256,128], index: 1, kind: input, shape index: {}]   ;;  %s981_s2 = inlined_call_operand.hbm [shape: bf16[128,128], index: 2, kind: input, shape index: {}]   ;;  %s982_s3 = inlined_call_operand.vmem [shape: f32[2,128], index: 3, kind: input, shape index: {}]   ;;  %s983_s4 = inlined_call_operand.hbm [shape: f32[2,128], index: 4, kind: output, shape index: {}]  }
   0x1   :  { %10 = vsyncpa [#allocation6], 0 }
   0x2   :  { %11 = vsyncpa [#allocation4], 0  ;;  %s811_s15 = smov [#allocation2]   ;;  %s739_s19 = scalar_lea.hbm %s980_s1, 2048 }
   0x3   :  { %s19_s16 = sshll.u32 %s811_s15, 4  ;;  %p740_p0 = scmp.ne.s32.totalorder %s980_s1, %s739_s19  ;;  %s20_s16 = int_to_ptr.vmem [resolvable:$true] %s19_s16 }
   0x4   :  { %p743_p1 = scmp.lt.u32.totalorder %s739_s19, %s980_s1 }
   0x6   :  { %p745_p2 = pnand %p743_p1, %p740_p0 }
   0x8   :  { %748 = shalt.err (!%p745_p2)
}
   0x9   :  { %s749_s24 = scalar_lea.vmem %s20_s16, 2048  ;;  %p754_p4 = scmp.lt.s32.totalorder %s20_s16, %s20_s16 }
   0xa   :  { %p750_p3 = scmp.ne.s32.totalorder %s20_s16, %s749_s24  ;;  %p755_p5 = scmp.lt.s32.totalorder %s749_s24, %s749_s24 }
   0xc   :  { %p756_p6 = por %p755_p5, %p754_p4 }
   0xe   :  { %p757_p7 = pnand %p756_p6, %p750_p3 }
  0x10   :  { %760 = shalt.err (!%p757_p7)
}
  0x11   :  { %s812_s25 = smov 64   ;;  %s813_s26 = smov 4  }
  0x12   :  { %25 = dma.hbm_to_vmem [thread:$0]  %s980_s1, 2048, %s20_s16, [#allocation3], %s812_s25, %s812_s25, %s813_s26  }
  0x13   :  { %s814_s29 = smov [#allocation5]   ;;  %s761_s7 = scalar_lea.hbm %s981_s2, 1024 }
  0x14   :  { %s31_s30 = sshll.u32 %s814_s29, 4  ;;  %p762_p8 = scmp.ne.s32.totalorder %s981_s2, %s761_s7  ;;  %s32_s30 = int_to_ptr.vmem [resolvable:$true] %s31_s30 }
  0x15   :  { %p765_p9 = scmp.lt.u32.totalorder %s761_s7, %s981_s2 }
  0x17   :  { %p767_p10 = pnand %p765_p9, %p762_p8 }
  0x19   :  { %770 = shalt.err (!%p767_p10)
}
  0x1a   :  { %s771_s12 = scalar_lea.vmem %s32_s30, 1024  ;;  %p776_p12 = scmp.lt.s32.totalorder %s32_s30, %s32_s30 }
  0x1b   :  { %p772_p11 = scmp.ne.s32.totalorder %s32_s30, %s771_s12  ;;  %p777_p13 = scmp.lt.s32.totalorder %s771_s12, %s771_s12 }
  0x1d   :  { %p778_p0 = por %p777_p13, %p776_p12 }
  0x1f   :  { %p779_p1 = pnand %p778_p0, %p772_p11 }
  0x21   :  { %782 = shalt.err (!%p779_p1)
}
  0x22   :  { %37 = dma.hbm_to_vmem [thread:$0]  %s981_s2, 1024, %s32_s30, [#allocation6], %s812_s25, %s812_s25, %s813_s26  }
  0x23   :  { %805 = dma.done.wait [#allocation3], 2048  }
  0x24   :  { %806 = vsyncadd [#allocation3], 4294965248 }
  0x25   :  { %807 = dma.done.wait [#allocation6], 1024  }
  0x26   :  { %808 = vsyncadd [#allocation6], 4294966272  ;;  %v815_v0 = vmov 0   ;;  %v65_v1 = vld [vmem:[%s979_s0] sm:$0x3]  ;;  %v701_v2 = vld [vmem:[#allocation2 + $0x40] sm:$0xff]   ;;  %v47_v18 = vlaneseq }
  0x27   :  { %700 = vset.pattern.permute.xlu0 %v815_v0  ;;  %v702_v3 = vld [vmem:[#allocation2] sm:$0xff]   ;;  %v703_v4 = vld [vmem:[#allocation2 + $0x48] sm:$0xff]   ;;  %627 = vmatprep.subr.bf16.mxu0 %v701_v2  ;;  %v705_v6 = vld [vmem:[#allocation2 + $0x50] sm:$0xff]   ;;  %v816_v49 = vmov 683565275   ;;  %s824_s18 = smov [#allocation7]  }
  0x28   :  { %68 = vperm.xlu0 %700, %v65_v1   ;;  %628 = vmatpush3.bf16.msra.mxu0 %v702_v3  ;;  %v704_v5 = vld [vmem:[#allocation2 + $0x8] sm:$0xff]   ;;  %v706_v7 = vld [vmem:[#allocation2 + $0x10] sm:$0xff]   ;;  %v707_v8 = vld [vmem:[#allocation2 + $0x58] sm:$0xff]   ;;  %v48_v19 = vand.u32 127, %v47_v18  ;;  %v817_v51 = vmov 2475754826  }
  0x29   :  { %629 = vmatprep.subr.bf16.mxu0 %v703_v4  ;;  %v708_v9 = vld [vmem:[#allocation2 + $0x18] sm:$0xff]   ;;  %v709_v10 = vld [vmem:[#allocation2 + $0x60] sm:$0xff]   ;;  %v711_v12 = vld [vmem:[#allocation2 + $0x68] sm:$0xff]   ;;  %v818_v53 = vmov 2131351028   ;;  %s580_s19 = sshll.u32 %s824_s18, 4  ;;  %s581_s19 = int_to_ptr.vmem [resolvable:$true] %s580_s19 }
  0x2a   :  { %v710_v11 = vld [vmem:[#allocation2 + $0x20] sm:$0xff]   ;;  %v712_v13 = vld [vmem:[#allocation2 + $0x28] sm:$0xff]   ;;  %v713_v14 = vld [vmem:[#allocation2 + $0x70] sm:$0xff]   ;;  %v55_v20 = vcvt.s32.f32 %v48_v19  ;;  %v819_v55 = vmov 1326507024   ;;  %s783_s20 = scalar_lea.vmem %s581_s19, 32  ;;  %p788_p3 = scmp.lt.s32.totalorder %s581_s19, %s581_s19 }
  0x2b   :  { %v714_v15 = vld [vmem:[#allocation2 + $0x30] sm:$0xff]   ;;  %v715_v16 = vld [vmem:[#allocation2 + $0x78] sm:$0xff]   ;;  %v820_v58 = vmov 2102212464   ;;  %v821_v60 = vmov 920167782   ;;  %p784_p2 = scmp.ne.s32.totalorder %s581_s19, %s783_s20  ;;  %p789_p4 = scmp.lt.s32.totalorder %s783_s20, %s783_s20 }
  0x2c   :  { %630 = vmatpush3.bf16.msra.mxu0 %v704_v5  ;;  %v716_v17 = vld [vmem:[#allocation2 + $0x38] sm:$0xff]   ;;  %v57_v21 = vmul.f32 -0.071955785, %v55_v20 }
  0x2d   :  { %631 = vmatprep.subr.bf16.mxu0 %v705_v6  ;;  %p790_p5 = por %p789_p4, %p788_p3 }
  0x2e   :  { %v59_v22 = vmul.f32 1.442695, %v57_v21 }
  0x2f   :  { %p791_p6 = pnand %p790_p5, %p784_p2 }
  0x30   :  { %632 = vmatpush3.bf16.msra.mxu0 %v706_v7  ;;  %725 = vpow2.f32 %v59_v22 }
  0x31   :  { %633 = vmatprep.subr.bf16.mxu0 %v707_v8 }
  0x34   :  { %634 = vmatpush3.bf16.msra.mxu0 %v708_v9 }
  0x35   :  { %635 = vmatprep.subr.bf16.mxu0 %v709_v10 }
  0x38   :  { %636 = vmatpush3.bf16.msra.mxu0 %v710_v11 }
  0x39   :  { %637 = vmatprep.subr.bf16.mxu0 %v711_v12 }
  0x3a   :  { %v726_v23 = vpop.eup %725 }
  0x3c   :  { %638 = vmatpush3.bf16.msra.mxu0 %v712_v13 }
  0x3d   :  { %639 = vmatprep.subr.bf16.mxu0 %v713_v14 }
  0x40   :  { %640 = vmatpush3.bf16.msra.mxu0 %v714_v15 }
  0x41   :  { %641 = vmatprep.subr.bf16.mxu0 %v715_v16 }
  0x44   :  { %642 = vmatpush3.bf16.msra.mxu0 %v716_v17 }
  0xa7   :  { %v69_v24 = vpop.permute.xlu0 %68 }
  0xa8   :  { %v877_v25 = vmul.f32 %v726_v23, %v69_v24 }
  0xaa   :  { %v78_v26 = vand.u32 2139095040, %v877_v25  ;;  %v881_v27 = vadd.f32 -1.5707964, %v877_v25  ;;  %v75_v31 = vand.u32 2147483647, %v877_v25 }
  0xac   :  { %v79_v28 = vshrl.u32 %v78_v26, 23  ;;  %v178_v29 = vand.u32 2147483647, %v881_v27  ;;  %v181_v30 = vand.u32 2139095040, %v881_v27  ;;  %v890_v37 = vand.u32 8388607, %v75_v31 }
  0xad   :  { %vm180_vm14 = vcmp.lt.s32.totalorder %v881_v27, 0 }
  0xae   :  { %v592_v32 = vadd.s32 4294967169, %v79_v28  ;;  %v182_v33 = vshrl.u32 %v181_v30, 23  ;;  %v185_v34 = vand.u32 8388607, %v178_v29  ;;  %v83_v43 = vor.u32 8388608, %v890_v37 }
  0xaf   :  { %vm938_vm15 = vcmp.le.f32.partialorder %v178_v29, 0.7853982 }
  0xb0   :  { %v85_v35 = vadd.s32 1, %v592_v32  ;;  %v596_v36 = vadd.s32 4294967169, %v182_v33  ;;  %v186_v38 = vor.u32 8388608, %v185_v34 }
  0xb2   :  { %vm86_vm0 = vcmp.gt.s32.totalorder %v85_v35, 0  ;;  %v188_v39 = vadd.s32 1, %v596_v36  ;;  %v895_v47 = vshll.u32 %v186_v38, 8 }
  0xb3   :  { %v87_v40 = vsel %vm86_vm0, %v85_v35, 0  ;;  %vm77_vm0 = vcmp.lt.s32.totalorder %v877_v25, 0 }
  0xb4   :  { %v89_v41 = vand.u32 31, %v87_v40  ;;  %vm189_vm1 = vcmp.gt.s32.totalorder %v188_v39, 0  ;;  %v893_v44 = vshrl.u32 %v87_v40, 5 }
  0xb5   :  { %v190_v42 = vsel %vm189_vm1, %v188_v39, 0  ;;  %vm950_vm1 = vcmp.le.f32.partialorder %v75_v31, 0.7853982 }
  0xb6   :  { %v90_v45 = vsub.s32 32, %v89_v41  ;;  %v192_v46 = vand.u32 31, %v190_v42  ;;  %v191_v48 = vshrl.u32 %v190_v42, 5  ;;  %v92_v50 = vshll.u32 %v816_v49, %v89_v41 }
  0xb7   :  { %v95_v52 = vshll.u32 %v817_v51, %v89_v41  ;;  %v98_v54 = vshll.u32 %v818_v53, %v89_v41  ;;  %v101_v59 = vshll.u32 %v820_v58, %v89_v41  ;;  %v104_v61 = vshll.u32 %v821_v60, %v89_v41 }
  0xb8   :  { %v897_v56 = vshrl.u32 %v819_v55, %v90_v45  ;;  %v193_v57 = vsub.s32 32, %v192_v46  ;;  %v195_v62 = vshll.u32 %v816_v49, %v192_v46  ;;  %v198_v63 = vshll.u32 %v817_v51, %v192_v46 }
  0xb9   :  { %v201_v0 = vshll.u32 %v818_v53, %v192_v46  ;;  %v204_v1 = vshll.u32 %v820_v58, %v192_v46  ;;  %v207_v5 = vshll.u32 %v821_v60, %v192_v46  ;;  %vm210_vm2 = vcmp.lt.s32.totalorder %v191_v48, 1 }
  0xba   :  { %v196_v2 = vshrl.u32 %v817_v51, %v193_v57  ;;  %v199_v3 = vshrl.u32 %v818_v53, %v193_v57  ;;  %v202_v4 = vshrl.u32 %v820_v58, %v193_v57  ;;  %v194_v6 = vshrl.u32 %v816_v49, %v193_v57 }
  0xbb   :  { %v205_v7 = vshrl.u32 %v821_v60, %v193_v57  ;;  %v208_v8 = vshrl.u32 %v819_v55, %v193_v57  ;;  %vm212_vm3 = vcmp.lt.s32.totalorder %v191_v48, 3  ;;  %vm213_vm4 = vcmp.lt.s32.totalorder %v191_v48, 4 }
  0xbc   :  { %v197_v9 = vor.u32 %v196_v2, %v195_v62  ;;  %v200_v10 = vor.u32 %v199_v3, %v198_v63  ;;  %v203_v11 = vor.u32 %v202_v4, %v201_v0  ;;  %v93_v14 = vshrl.u32 %v817_v51, %v90_v45 }
  0xbd   :  { %v206_v12 = vor.u32 %v205_v7, %v204_v1  ;;  %v209_v13 = vor.u32 %v208_v8, %v207_v5  ;;  %vm211_vm5 = vcmp.lt.s32.totalorder %v191_v48, 2  ;;  %v96_v26 = vshrl.u32 %v818_v53, %v90_v45 }
  0xbe   :  { %v214_v15 = vsel %vm210_vm2, %v194_v6, %v197_v9  ;;  %v215_v16 = vsel %vm213_vm4, %v203_v11, 2102212464  ;;  %v218_v17 = vsel %vm210_vm2, %v197_v9, %v200_v10  ;;  %v222_v18 = vsel %vm210_vm2, %v200_v10, %v203_v11 }
  0xbf   :  { %v216_v19 = vsel %vm212_vm3, %v200_v10, %v215_v16  ;;  %v219_v20 = vsel %vm213_vm4, %v206_v12, 920167782  ;;  %v223_v21 = vsel %vm213_vm4, %v209_v13, 1326507024  ;;  %v94_v24 = vor.u32 %v93_v14, %v92_v50 }
  0xc0   :  { %v220_v22 = vsel %vm212_vm3, %v203_v11, %v219_v20  ;;  %v224_v23 = vsel %vm212_vm3, %v206_v12, %v223_v21  ;;  %v217_v28 = vsel %vm211_vm5, %v214_v15, %v216_v19  ;;  %v99_v33 = vshrl.u32 %v820_v58, %v90_v45 }
  0xc1   :  { %v221_v30 = vsel %vm211_vm5, %v218_v17, %v220_v22  ;;  %v225_v32 = vsel %vm211_vm5, %v222_v18, %v224_v23  ;;  %v97_v39 = vor.u32 %v96_v26, %v95_v52  ;;  %v102_v41 = vshrl.u32 %v821_v60, %v90_v45 }
  0xc2   :  { %v900_v34 = vmul.u32.u64.low %v895_v47, %v225_v32  ;;  %v901_v35 = vmul.u32.u64.high %v895_v47, %v225_v32, %v900_v34  ;;  %v904_v36 = vmul.u32.u64.low %v895_v47, %v221_v30  ;;  %v905_v38 = vmul.u32.u64.high %v895_v47, %v221_v30, %v904_v36 }
  0xc3   :  { %v100_v40 = vor.u32 %v99_v33, %v98_v54  ;;  %v106_v42 = vor.u32 %v897_v56, %v104_v61  ;;  %v233_v46 = vmul.u32 %v895_v47, %v217_v28  ;;  %v91_v48 = vshrl.u32 %v816_v49, %v90_v45 }
  0xc4   :  { %v123_v50 = vshll.u32 %v83_v43, 8  ;;  %v103_v51 = vor.u32 %v102_v41, %v101_v59  ;;  %vm107_vm6 = vcmp.lt.s32.totalorder %v893_v44, 1  ;;  %vm108_vm7 = vcmp.lt.s32.totalorder %v893_v44, 2 }
  0xc5   :  { %vm110_vm8 = vcmp.lt.s32.totalorder %v893_v44, 4  ;;  %vm235_vm9 = vc.u32 %v901_v35, %v904_v36  ;;  %v236_v52 = vadd.s32 1, %v905_v38  ;;  %v115_v54 = vsel %vm107_vm6, %v94_v24, %v97_v39 }
  0xc6   :  { %v112_v53 = vsel %vm110_vm8, %v100_v40, 2102212464  ;;  %vm109_vm10 = vcmp.lt.s32.totalorder %v893_v44, 3  ;;  %v116_v47 = vsel %vm110_vm8, %v103_v51, 920167782  ;;  %v119_v45 = vsel %vm107_vm6, %v97_v39, %v100_v40 }
  0xc7   :  { %v120_v49 = vsel %vm110_vm8, %v106_v42, 1326507024  ;;  %v237_v37 = vsel %vm235_vm9, %v236_v52, %v905_v38  ;;  %v111_v43 = vsel %vm107_vm6, %v91_v48, %v94_v24  ;;  %v117_v55 = vsel %vm109_vm10, %v100_v40, %v116_v47 }
  0xc8   :  { %v121_v56 = vsel %vm109_vm10, %v103_v51, %v120_v49  ;;  %v238_v57 = vadd.s32 %v237_v37, %v233_v46  ;;  %v113_v58 = vsel %vm109_vm10, %v97_v39, %v112_v53  ;;  %v118_v59 = vsel %vm108_vm7, %v115_v54, %v117_v55 }
  0xc9   :  { %v122_v60 = vsel %vm108_vm7, %v119_v45, %v121_v56  ;;  %v925_v63 = vmul.u32.u64.low %v123_v50, %v118_v59  ;;  %v926_v0 = vmul.u32.u64.high %v123_v50, %v118_v59, %v925_v63  ;;  %v114_v2 = vsel %vm108_vm7, %v111_v43, %v113_v58 }
  0xca   :  { %v922_v61 = vmul.u32.u64.low %v123_v50, %v122_v60  ;;  %v923_v62 = vmul.u32.u64.high %v123_v50, %v122_v60, %v922_v61  ;;  %v239_v1 = vadd.s32 536870912, %v238_v57  ;;  %v130_v6 = vmul.u32 %v123_v50, %v114_v2 }
  0xcb   :  { %v133_v4 = vadd.s32 1, %v926_v0  ;;  %v234_v19 = vadd.s32 %v904_v36, %v901_v35  ;;  %vm270_vm5 = vweird.f32 %v881_v27  ;;  %vm167_vm9 = vweird.f32 %v877_v25 }
  0xcc   :  { %v240_v3 = vshrl.u32 %v239_v1, 30  ;;  %vm132_vm11 = vc.u32 %v923_v62, %v925_v63  ;;  %v131_v41 = vadd.s32 %v925_v63, %v923_v62  ;;  %vm823_vm10 = vmmov 0  }
  0xcd   :  { %v134_v7 = vsel %vm132_vm11, %v133_v4, %v926_v0 }
  0xce   :  { %v241_v5 = vshll.u32 %v240_v3, 30  ;;  %v135_v9 = vadd.s32 %v134_v7, %v130_v6  ;;  %v264_v45 = vsub.s32 4, %v240_v3 }
  0xd0   :  { %v242_v8 = vsub.s32 %v238_v57, %v241_v5  ;;  %v136_v11 = vadd.s32 536870912, %v135_v9  ;;  %v265_v56 = vsel %vm180_vm14, %v264_v45, %v240_v3 }
  0xd1   :  { %v267_v58 = vsel %vm938_vm15, 0, %v265_v56 }
  0xd2   :  { %v244_v10 = vsub.s32 0, %v242_v8  ;;  %v137_v13 = vshrl.u32 %v136_v11, 30  ;;  %v271_v62 = vand.u32 3, %v267_v58 }
  0xd4   :  { %v597_v12 = vmin.u32 %v244_v10, %v242_v8  ;;  %v138_v15 = vshll.u32 %v137_v13, 30  ;;  %v161_v61 = vsub.s32 4, %v137_v13  ;;  %vm276_vm2 = vcmp.eq.s32.totalorder %v271_v62, 2 }
  0xd5   :  { %vm273_vm3 = vcmp.eq.s32.totalorder %v271_v62, 0  ;;  %vm272_vm4 = vcmp.lt.s32.totalorder %v271_v62, 2 }
  0xd6   :  { %v246_v14 = vclz %v597_v12  ;;  %v139_v44 = vsub.s32 %v135_v9, %v138_v15  ;;  %v162_v3 = vsel %vm77_vm0, %v161_v61, %v137_v13 }
  0xd7   :  { %v164_v6 = vsel %vm950_vm1, 0, %v162_v3 }
  0xd8   :  { %v598_v16 = vadd.s32 4294967294, %v246_v14  ;;  %v141_v18 = vsub.s32 0, %v139_v44  ;;  %v168_v10 = vand.u32 3, %v164_v6 }
  0xda   :  { %vm599_vm12 = vcmp.lt.s32.totalorder %v598_v16, 0  ;;  %v593_v22 = vmin.u32 %v141_v18, %v139_v44  ;;  %vm173_vm6 = vcmp.eq.s32.totalorder %v168_v10, 2  ;;  %vm170_vm7 = vcmp.eq.s32.totalorder %v168_v10, 0 }
  0xdb   :  { %v249_v17 = vsel %vm599_vm12, 0, %v598_v16  ;;  %vm169_vm8 = vcmp.lt.s32.totalorder %v168_v10, 2 }
  0xdc   :  { %v250_v20 = vsub.s32 32, %v249_v17  ;;  %v254_v21 = vsub.s32 4294967266, %v249_v17  ;;  %v251_v23 = vshll.u32 %v242_v8, %v249_v17  ;;  %v143_v28 = vclz %v593_v22  ;;  %v720_v22 = vld [vmem:[#allocation5 + $0x18] sm:$0xff]  }
  0xde   :  { %v252_v24 = vshrl.u32 %v234_v19, %v250_v20  ;;  %v255_v26 = vadd.s32 127, %v254_v21  ;;  %v594_v33 = vadd.s32 4294967294, %v143_v28  ;;  %v822_v19 = vmov 0.0   ;;  %v718_v20 = vld [vmem:[#allocation5 + $0x8] sm:$0xff]   ;;  %v719_v21 = vld [vmem:[#allocation5 + $0x10] sm:$0xff]  }
  0xdf   :  { %658 = vmatprep.subr.bf16.mxu1 %v822_v19  ;;  %674 = vmatprep.mubr.msk.bf16.mxu1 %vm823_vm10, %v822_v19 }
  0xe0   :  { %v253_v30 = vor.u32 %v252_v24, %v251_v23  ;;  %v256_v32 = vshll.u32 %v255_v26, 23  ;;  %vm595_vm13 = vcmp.lt.s32.totalorder %v594_v33, 0  ;;  %v721_v23 = vld [vmem:[#allocation5 + $0x20] sm:$0xff]   ;;  %v723_v24 = vld [vmem:[#allocation5 + $0x30] sm:$0xff]   ;;  %v724_v26 = vld [vmem:[#allocation5 + $0x38] sm:$0xff]  }
  0xe1   :  { %v146_v40 = vsel %vm595_vm13, 0, %v594_v33 }
  0xe2   :  { %v257_v34 = vor.u32 4788187, %v256_v32  ;;  %v260_v39 = vcvt.s32.f32 %v253_v30  ;;  %v147_v42 = vsub.s32 32, %v146_v40  ;;  %v151_v46 = vsub.s32 4294967266, %v146_v40  ;;  %v600_v30 = vld [vmem:[%s982_s3] ss:$0 sm:$0xff] }
  0xe3   :  { %v148_v36 = vshll.u32 %v139_v44, %v146_v40 }
  0xe4   :  { %v258_v38 = vand.u32 2147483647, %v257_v34  ;;  %v149_v48 = vshrl.u32 %v131_v41, %v147_v42  ;;  %v152_v50 = vadd.s32 127, %v151_v46 }
  0xe6   :  { %v261_v35 = vmul.f32 %v260_v39, %v258_v38  ;;  %v150_v52 = vor.u32 %v149_v48, %v148_v36  ;;  %v153_v53 = vshll.u32 %v152_v50, 23  ;;  %v618_v48 = vld [vmem:[%s982_s3 + $0x1] ss:$0 sm:$0xff] }
  0xe8   :  { %v262_v51 = vxor.u32 2147483648, %v261_v35  ;;  %v154_v37 = vor.u32 4788187, %v153_v53  ;;  %v157_v55 = vcvt.s32.f32 %v150_v52 }
  0xea   :  { %v263_v47 = vsel %vm180_vm14, %v262_v51, %v261_v35  ;;  %v155_v43 = vand.u32 2147483647, %v154_v37 }
  0xeb   :  { %v266_v49 = vsel %vm938_vm15, %v881_v27, %v263_v47  ;;  %v717_v27 = vld [vmem:[#allocation5] sm:$0xff]  }
  0xec   :  { %727 = vcosq.f32 %v266_v49  ;;  %v158_v57 = vmul.f32 %v157_v55, %v155_v43  ;;  %659 = vmatpush3.bf16.msra.mxu1 %v717_v27 }
  0xed   :  { %729 = vsinq.f32 %v266_v49  ;;  %660 = vmatprep.subr.bf16.mxu1 %v822_v19 }
  0xee   :  { %v159_v29 = vxor.u32 2147483648, %v158_v57 }
  0xf0   :  { %v160_v60 = vsel %vm77_vm0, %v159_v29, %v158_v57  ;;  %661 = vmatpush3.bf16.msra.mxu1 %v718_v20 }
  0xf1   :  { %v163_v63 = vsel %vm950_vm1, %v877_v25, %v160_v60  ;;  %662 = vmatprep.subr.bf16.mxu1 %v822_v19  ;;  %v722_v25 = vld [vmem:[#allocation5 + $0x28] sm:$0xff]  }
  0xf2   :  { %731 = vcosq.f32 %v163_v63 }
  0xf3   :  { %733 = vsinq.f32 %v163_v63 }
  0xf4   :  { %663 = vmatpush3.bf16.msra.mxu1 %v719_v21 }
  0xf5   :  { %664 = vmatprep.subr.bf16.mxu1 %v822_v19 }
  0xf6   :  { %v728_v0 = vpop.eup %727 }
  0xf7   :  { %v730_v1 = vpop.eup %729  ;;  %v277_v2 = vxor.u32 2147483648, %v728_v0 }
  0xf8   :  { %v274_v4 = vxor.u32 2147483648, %v730_v1  ;;  %665 = vmatpush3.bf16.msra.mxu1 %v720_v22 }
  0xf9   :  { %v278_v31 = vsel %vm276_vm2, %v277_v2, %v730_v1  ;;  %666 = vmatprep.subr.bf16.mxu1 %v822_v19 }
  0xfa   :  { %v275_v5 = vsel %vm273_vm3, %v728_v0, %v274_v4 }
  0xfb   :  { %v279_v7 = vsel %vm272_vm4, %v275_v5, %v278_v31 }
  0xfc   :  { %v280_v8 = vsel %vm270_vm5, nan, %v279_v7  ;;  %v732_v11 = vpop.eup %731  ;;  %667 = vmatpush3.bf16.msra.mxu1 %v721_v23 }
  0xfd   :  { %v282_v9 = vpack.c.bf16 %v280_v8, %v280_v8  ;;  %v734_v12 = vpop.eup %733  ;;  %v174_v14 = vxor.u32 2147483648, %v732_v11  ;;  %668 = vmatprep.subr.bf16.mxu1 %v822_v19 }
  0xfe   :  { %v171_v13 = vxor.u32 2147483648, %v734_v12 }
  0xff   :  { %448 = vmatprep.mubr.bf16.mxu0 %v282_v9  ;;  %v175_v15 = vsel %vm173_vm6, %v174_v14, %v734_v12 }
 0x100   :  { %v172_v16 = vsel %vm170_vm7, %v732_v11, %v171_v13  ;;  %669 = vmatpush3.bf16.msra.mxu1 %v722_v25 }
 0x101   :  { %v176_v44 = vsel %vm169_vm8, %v172_v16, %v175_v15  ;;  %670 = vmatprep.subr.bf16.mxu1 %v822_v19 }
 0x102   :  { %v177_v17 = vsel %vm167_vm9, nan, %v176_v44 }
 0x103   :  { %v281_v18 = vpack.c.bf16 %v177_v17, %v177_v17 }
 0x104   :  { %671 = vmatpush3.bf16.msra.mxu1 %v723_v24 }
 0x105   :  { %449 = vmatmul.mubr.bf16.vlgmr.msra.gmra.mrb[0].mxu0 %v281_v18  ;;  %672 = vmatprep.subr.bf16.mxu1 %v822_v19 }
 0x108   :  { %673 = vmatpush3.bf16.msra.mxu1 %v724_v26 }
 0x1d8   :  { %v643_v28 = vpop.f32.mrb[0].mxu0 }
 0x1d9   :  { %v644_v32 = vpop.f32.mrb[1].mxu0 }
 0x1da   :  { %v645_v33 = vadd.f32 %v644_v32, %v643_v28  ;;  %v646_v34 = vpop.f32.mrb[2].mxu0 }
 0x1db   :  { %v647_v38 = vpop.f32.mrb[3].mxu0 }
 0x1dc   :  { %v451_v39 = vadd.f32 %v645_v33, %v600_v30 }
 0x1de   :  { %v617_v40 = vmul.f32 -1.442695, %v451_v39 }
 0x1e0   :  { %735 = vpow2.f32 %v617_v40 }
 0x1ea   :  { %v736_v41 = vpop.eup %735 }
 0x1eb   :  { %v459_v42 = vadd.f32 1.0, %v736_v41 }
 0x1ed   :  { %737 = vrcp.f32 %v459_v42 }
 0x1f7   :  { %v738_v46 = vpop.eup %737 }
 0x1f8   :  { %v462_v35 = vmul.f32 %v738_v46, %v451_v39 }
 0x1fa   :  { %v463_v36 = vpack.c.bf16 %v462_v35, %v462_v35 }
 0x1fc   :  { %675 = vmatmul.mubr.bf16.vlgmr.msra.gmra.mrb[0].mxu1 %v463_v36 }
 0x2cf   :  { %v567_v50 = vpop.f32.mrb[0].mxu1 }
 0x2d0   :  { %v568_v51 = vadd.f32 %v618_v48, %v567_v50  ;;  %v676_v52 = vpop.f32.mrb[1].mxu1 }
 0x2d1   :  { %v570_v53 = vpop.f32.mrb[2].mxu1 }
 0x2d2   :  { %573 = vst [vmem:[#allocation7] sm:$0x3] %v568_v51  ;;  %v677_v54 = vpop.f32.mrb[3].mxu1 }
 0x2d3   :  { %794 = shalt.err (!%p791_p6)
}
 0x2d4   :  { %s795_s3 = scalar_lea.hbm %s983_s4, 32 }
 0x2d5   :  { %p796_p7 = scmp.ne.s32.totalorder %s983_s4, %s795_s3  ;;  %p799_p8 = scmp.lt.u32.totalorder %s795_s3, %s983_s4 }
 0x2d7   :  { %p801_p9 = pnand %p799_p8, %p796_p7 }
 0x2d9   :  { %804 = shalt.err (!%p801_p9)
}
 0x2da   :  { %583 = dma.vmem_to_hbm [thread:$0]  %s581_s19, 32, %s983_s4, [#allocation4]  }
 0x2db   :  { %809 = dma.done.wait [#allocation4], 32  }
 0x2dc   :  { %810 = vsyncadd [#allocation4], 4294967264 }
 0x2dd   :  { %587 = vsyncpa [#allocation3], 1 }
 0x2de   :  { %588 = vsyncpa [#allocation6], 1 }
 0x2df   :  { %589 = vsyncpa [#allocation4], 1 }

</bundles_post_ra>
